<compile_context>
chip_gen: v7x
topology: tpu7x:2x2x1
jax: 0.10.0
libtpu: 0.0.40
codegen_flags: <defaults>
</compile_context>

<pallas_src>
import functools

import jax
import jax.numpy as jnp
from jax.experimental import pallas as pl
from jax.experimental.pallas import tpu as pltpu


def sine_activation_kernel(tau_ref, w_ref, b_ref, o_ref, *, out_features):
    # (TB, PACK*in) x (PACK*in, PACK*out) on the MXU (essentially free;
    # the kernel is VALU-bound on the sin polynomial).
    z = jnp.dot(tau_ref[...], w_ref[...], preferred_element_type=jnp.float32)
    z = z + b_ref[...]  # (1, PACK*out) broadcasts over the batch tile

    lanes = o_ref.shape[1]
    lane = jax.lax.broadcasted_iota(jnp.int32, (1, lanes), 1)
    # Within each packed group of `out_features` lanes, the last lane is the
    # linear (w0/b0) term; all others get sin().
    is_sin = (lane % out_features) < (out_features - 1)
    o_ref[...] = jnp.where(is_sin, jnp.sin(z), z).astype(o_ref.dtype)


def pack_t2v_params(w, b, w0, b0):
    """Fuse and lane-pack the Time2Vec parameters.

    Call ONCE per parameter set (hoisted out of the per-forward path).
    """
    in_features = w.shape[0]
    out_features = w.shape[1] + 1
    w_full = jnp.concatenate([w, w0], axis=1)           # (in, out)
    b_full = jnp.concatenate([b, b0], axis=0)[None, :]  # (1, out)

    if out_features <= 128 and 128 % out_features == 0:
        pack = 128 // out_features                      # rows packed per vreg row
    else:
        pack = 1
    # Block-diagonal weight: each packed row's features hit its own copy of w_full.
    w_blk = jnp.kron(jnp.eye(pack, dtype=w_full.dtype), w_full)  # (pack*in, pack*out)
    b_blk = jnp.tile(b_full, (1, pack))                          # (1, pack*out)
    return dict(
        w_blk=w_blk,
        b_blk=b_blk,
        pack=pack,
        in_features=in_features,
        out_features=out_features,
    )


def sine_activation_pallas(tau, params, *, tb=1024):
    """Pallas forward: tau (B, in_features) -> (B, out_features)."""
    pack = params["pack"]
    out_features = params["out_features"]
    in_features = params["in_features"]
    w_blk, b_blk = params["w_blk"], params["b_blk"]

    B = tau.shape[0]
    lanes = pack * out_features
    kin = pack * in_features

    # Pad batch so it splits into (rows of `pack`) x (grid of tb-row tiles).
    rows = pl.cdiv(B, pack)
    tb = min(tb, rows)
    rows_pad = pl.cdiv(rows, tb) * tb
    total_rows = rows_pad * pack
    if total_rows != B:
        tau = jnp.pad(tau, ((0, total_rows - B), (0, 0)))
    tau_packed = tau.reshape(rows_pad, kin)  # free, row-major

    grid = (rows_pad // tb,)
    out_packed = pl.pallas_call(
        functools.partial(sine_activation_kernel, out_features=out_features),
        out_shape=jax.ShapeDtypeStruct((rows_pad, lanes), tau.dtype),
        grid_spec=pltpu.PrefetchScalarGridSpec(
            num_scalar_prefetch=0,
            grid=grid,
            in_specs=[
                pl.BlockSpec((tb, kin), lambda i: (i, 0)),       # batch tile
                pl.BlockSpec((kin, lanes), lambda i: (0, 0)),    # resident weight
                pl.BlockSpec((1, lanes), lambda i: (0, 0)),      # resident bias
            ],
            out_specs=pl.BlockSpec((tb, lanes), lambda i: (i, 0)),
        ),
        compiler_params=pltpu.CompilerParams(
            dimension_semantics=("parallel",),
        ),
    )(tau_packed, w_blk, b_blk)

    return out_packed.reshape(rows_pad * pack, out_features)[:B]


def sine_activation_reference(tau, w, b, w0, b0):
    v1 = jnp.sin(tau @ w + b)
    v2 = tau @ w0 + b0
    return jnp.concatenate([v1, v2], axis=1)


def sine_activation(tau, params, raw_params, *, min_rows_for_pallas=2048, tb=1024):
    """Dispatch: at tiny batches the pallas_call is pure launch overhead."""
    if tau.shape[0] < min_rows_for_pallas:
        w, b, w0, b0 = raw_params
        return sine_activation_reference(tau, w, b, w0, b0)
    return sine_activation_pallas(tau, params, tb=tb)


if __name__ == "__main__":
    # Small shapes consistent with the module: in_features=4, out_features=32.
    in_features = 4
    out_features = 32
    B = 8

    key = jax.random.PRNGKey(0)
    k_tau, k_w0, k_b0, k_w, k_b = jax.random.split(key, 5)

    tau = jax.random.normal(k_tau, (B, in_features), dtype=jnp.float32)
    w0 = jax.random.normal(k_w0, (in_features, 1), dtype=jnp.float32)
    b0 = jax.random.normal(k_b0, (1,), dtype=jnp.float32)
    w = jax.random.normal(k_w, (in_features, out_features - 1), dtype=jnp.float32)
    b = jax.random.normal(k_b, (out_features - 1,), dtype=jnp.float32)

    # Hoisted, once-per-parameter-set packing.
    params = pack_t2v_params(w, b, w0, b0)

    # 1) Exercise the kernel at the toy shape (single grid step, full block).
    out = sine_activation_pallas(tau, params)
    out = jax.block_until_ready(out)
    ref = sine_activation_reference(tau, w, b, w0, b0)
    assert out.shape == (B, out_features)
    assert jnp.allclose(out, ref, atol=1e-5, rtol=1e-5)

    # 2) Exercise the tiled/padded path (grid > 1, batch not a multiple of
    #    pack or tile) to validate the lane-dense packing end to end.
    B2 = 1030
    tau2 = jax.random.normal(jax.random.PRNGKey(1), (B2, in_features), dtype=jnp.float32)
    out2 = sine_activation_pallas(tau2, params, tb=64)
    out2 = jax.block_until_ready(out2)
    ref2 = sine_activation_reference(tau2, w, b, w0, b0)
    assert out2.shape == (B2, out_features)
    assert jnp.allclose(out2, ref2, atol=1e-5, rtol=1e-5)

    print("KERNEL_OK")
</pallas_src>

<mosaic_0001>
module attributes {stable_mosaic.version = 11 : i64} {
  func.func @sine_activation_kernel(%arg0: i32, %arg1: memref<2x16xf32, #tpu.memory_space<vmem>>, %arg2: memref<16x128xf32, #tpu.memory_space<vmem>>, %arg3: memref<1x128xf32, #tpu.memory_space<vmem>>, %arg4: memref<2x128xf32, #tpu.memory_space<vmem>>) attributes {dimension_semantics = [#tpu.dimension_semantics<parallel>], iteration_bounds = array<i64: 1>, scalar_prefetch = 0 : i64, scratch_operands = 0 : i64, tpu.core_type = #tpu.core_type<tc>, window_params = [{transform_indices = @transform_0, window_bounds = array<i64: 2, 16>}, {pipeline_mode = #tpu.pipeline_mode<synchronous>, transform_indices = @transform_1, window_bounds = array<i64: 16, 128>}, {pipeline_mode = #tpu.pipeline_mode<synchronous>, transform_indices = @transform_2, window_bounds = array<i64: 1, 128>}, {transform_indices = @transform_3, window_bounds = array<i64: 2, 128>}]} {
    %c0 = arith.constant 0 : index
    %c0_0 = arith.constant 0 : index
    %0 = vector.load %arg1[%c0, %c0_0] : memref<2x16xf32, #tpu.memory_space<vmem>>, vector<2x16xf32>
    %c0_1 = arith.constant 0 : index
    %c0_2 = arith.constant 0 : index
    %1 = vector.load %arg2[%c0_1, %c0_2] : memref<16x128xf32, #tpu.memory_space<vmem>>, vector<16x128xf32>
    %cst = arith.constant dense<0.000000e+00> : vector<2x128xf32>
    %2 = tpu.matmul %0, %1, %cst {dimension_numbers = #tpu.dot_dimension_numbers<[1], [0], [0], [1], [0, 0, 1, 1], [], []>} : vector<2x16xf32>, vector<16x128xf32>, vector<2x128xf32> -> vector<2x128xf32>
    %c0_3 = arith.constant 0 : index
    %c0_4 = arith.constant 0 : index
    %3 = vector.load %arg3[%c0_3, %c0_4] : memref<1x128xf32, #tpu.memory_space<vmem>>, vector<1x128xf32>
    %4 = vector.broadcast %3 : vector<1x128xf32> to vector<2x128xf32>
    %5 = arith.addf %2, %4 : vector<2x128xf32>
    %6 = tpu.iota {dimensions = array<i32: 1>} : vector<1x128xi32>
    %c32_i32 = arith.constant 32 : i32
    %c0_i32 = arith.constant 0 : i32
    %7 = arith.cmpi eq, %c32_i32, %c0_i32 : i32
    %c1_i32 = arith.constant 1 : i32
    %8 = arith.select %7, %c1_i32, %c32_i32 : i32
    %9 = vector.broadcast %8 : i32 to vector<1x128xi32>
    %10 = arith.remsi %6, %9 : vector<1x128xi32>
    %c0_i32_5 = arith.constant 0 : i32
    %11 = vector.broadcast %c0_i32_5 : i32 to vector<1x128xi32>
    %12 = arith.cmpi ne, %10, %11 : vector<1x128xi32>
    %c0_i32_6 = arith.constant 0 : i32
    %13 = vector.broadcast %c0_i32_6 : i32 to vector<1x128xi32>
    %14 = arith.cmpi slt, %10, %13 : vector<1x128xi32>
    %c0_i32_7 = arith.constant 0 : i32
    %15 = arith.cmpi slt, %8, %c0_i32_7 : i32
    %16 = vector.broadcast %15 : i1 to vector<1x128xi1>
    %17 = vector.broadcast %16 : vector<1x128xi1> to vector<1x128xi1>
    %18 = arith.xori %14, %17 : vector<1x128xi1>
    %19 = arith.andi %18, %12 : vector<1x128xi1>
    %20 = vector.broadcast %8 : i32 to vector<1x128xi32>
    %21 = arith.addi %10, %20 : vector<1x128xi32>
    %22 = arith.select %19, %21, %10 : vector<1x128xi1>, vector<1x128xi32>
    %c31_i32 = arith.constant 31 : i32
    %23 = vector.broadcast %c31_i32 : i32 to vector<1x128xi32>
    %24 = arith.cmpi slt, %22, %23 : vector<1x128xi32>
    %25 = math.sin %5 : vector<2x128xf32>
    %26 = vector.shape_cast %24 : vector<1x128xi1> to vector<1x128xi1>
    %27 = vector.broadcast %26 : vector<1x128xi1> to vector<2x128xi1>
    %28 = arith.select %27, %25, %5 : vector<2x128xi1>, vector<2x128xf32>
    %c0_8 = arith.constant 0 : index
    %c0_9 = arith.constant 0 : index
    %29 = vector.load %arg4[%c0_8, %c0_9] : memref<2x128xf32, #tpu.memory_space<vmem>>, vector<2x128xf32>
    tpu.vector_store %arg4[%c0_8, %c0_9], %28 {strides = array<i32>} : memref<2x128xf32, #tpu.memory_space<vmem>>, vector<2x128xf32>,
    return
  }
  func.func @transform_0(%arg0: i32) -> (i32, i32) {
    %c0_i32 = arith.constant 0 : i32
    %c0_i32_0 = arith.constant 0 : i32
    return %arg0, %c0_i32 : i32, i32
  }
  func.func @transform_1(%arg0: i32) -> (i32, i32) {
    %c0_i32 = arith.constant 0 : i32
    %c0_i32_0 = arith.constant 0 : i32
    %c0_i32_1 = arith.constant 0 : i32
    return %c0_i32, %c0_i32_0 : i32, i32
  }
  func.func @transform_2(%arg0: i32) -> (i32, i32) {
    %c0_i32 = arith.constant 0 : i32
    %c0_i32_0 = arith.constant 0 : i32
    %c0_i32_1 = arith.constant 0 : i32
    return %c0_i32, %c0_i32_0 : i32, i32
  }
  func.func @transform_3(%arg0: i32) -> (i32, i32) {
    %c0_i32 = arith.constant 0 : i32
    %c0_i32_0 = arith.constant 0 : i32
    return %arg0, %c0_i32 : i32, i32
  }
}

</mosaic_0001>

<bundles_post_ra>
// kernel: tpu_custom_call.1
= control target key start
LH: loop header
LB: loop body
LE: loop exit
PB: predicated region body
PF: predicated region fallthrough
CT: control target
= control target key end

     0   :  { %8 = vsyncpa [#allocation3], 0  ;;  %s479_s0 = inlined_call_operand.hbm [shape: f32[2,16], index: 0, kind: input, shape index: {}]   ;;  %s480_s1 = inlined_call_operand.hbm [shape: f32[16,128], index: 1, kind: input, shape index: {}]   ;;  %s481_s2 = inlined_call_operand.vmem [shape: f32[1,128], index: 2, kind: input, shape index: {}]   ;;  %s482_s3 = inlined_call_operand.hbm [shape: f32[2,128], index: 3, kind: output, shape index: {}]  }
   0x1   :  { %9 = vsyncpa [#allocation6], 0 }
   0x2   :  { %10 = vsyncpa [#allocation4], 0  ;;  %s377_s12 = smov [#allocation2]   ;;  %s378_s14 = smov [#allocation5]  }
   0x3   :  { %s17_s13 = sshll.u32 %s377_s12, 4  ;;  %s26_s15 = sshll.u32 %s378_s14, 4  ;;  %s18_s13 = int_to_ptr.vmem [resolvable:$true] %s17_s13  ;;  %s411_s15 = int_to_ptr.vmem [resolvable:$true] %s26_s15 }
   0x4   :  { %s305_s18 = scalar_lea.hbm %s479_s0, 32 }
   0x5   :  { %p306_p0 = scmp.ne.s32.totalorder %s479_s0, %s305_s18  ;;  %p309_p1 = scmp.lt.u32.totalorder %s305_s18, %s479_s0 }
   0x7   :  { %p311_p2 = pnand %p309_p1, %p306_p0 }
   0x9   :  { %314 = shalt.err (!%p311_p2)
}
   0xa   :  { %s315_s23 = scalar_lea.vmem %s18_s13, 32  ;;  %p320_p4 = scmp.lt.s32.totalorder %s18_s13, %s18_s13 }
   0xb   :  { %p316_p3 = scmp.ne.s32.totalorder %s18_s13, %s315_s23  ;;  %p321_p5 = scmp.lt.s32.totalorder %s315_s23, %s315_s23 }
   0xd   :  { %p322_p6 = por %p321_p5, %p320_p4 }
   0xf   :  { %p323_p7 = pnand %p322_p6, %p316_p3 }
  0x11   :  { %326 = shalt.err (!%p323_p7)
}
  0x12   :  { %20 = dma.hbm_to_vmem [thread:$0]  %s479_s0, 32, %s18_s13, [#allocation3]  }
  0x13   :  { %s327_s28 = scalar_lea.hbm %s480_s1, 256 }
  0x14   :  { %p328_p8 = scmp.ne.s32.totalorder %s480_s1, %s327_s28  ;;  %p331_p9 = scmp.lt.u32.totalorder %s327_s28, %s480_s1 }
  0x16   :  { %p333_p10 = pnand %p331_p9, %p328_p8 }
  0x18   :  { %336 = shalt.err (!%p333_p10)
}
  0x19   :  { %s337_s6 = scalar_lea.vmem %s411_s15, 256  ;;  %p342_p12 = scmp.lt.s32.totalorder %s411_s15, %s411_s15 }
  0x1a   :  { %p338_p11 = scmp.ne.s32.totalorder %s411_s15, %s337_s6  ;;  %p343_p13 = scmp.lt.s32.totalorder %s337_s6, %s337_s6 }
  0x1c   :  { %p344_p0 = por %p343_p13, %p342_p12 }
  0x1e   :  { %p345_p1 = pnand %p344_p0, %p338_p11 }
  0x20   :  { %348 = shalt.err (!%p345_p1)
}
  0x21   :  { %s379_s0 = smov 128   ;;  %s380_s7 = smov 8  }
  0x22   :  { %32 = dma.hbm_to_vmem [thread:$0]  %s480_s1, 256, %s411_s15, [#allocation6], %s379_s0, %s379_s0, %s380_s7  }
  0x23   :  { %371 = dma.done.wait [#allocation3], 32  }
  0x24   :  { %372 = vsyncadd [#allocation3], 4294967264 }
  0x25   :  { %373 = dma.done.wait [#allocation6], 256  }
  0x26   :  { %374 = vsyncadd [#allocation6], 4294967040  ;;  %v381_v0 = vmov 0.0|0.0   ;;  %vm382_vm0 = vmmov 0   ;;  %v383_v1 = vmov 0.0   ;;  %v42_v2 = vld [vmem:[#allocation5] sm:$0xff] }
  0x27   :  { %280 = vmatprep.subr.bf16.mxu0 %v381_v0  ;;  %277 = vmatprep.mubr.msk.f32.mxu0 %vm382_vm0, %v383_v1  ;;  %v43_v3 = vld [vmem:[#allocation5 + $0x8] sm:$0xff]  ;;  %v41_v5 = vld [vmem:[#allocation2] sm:$0x3]  ;;  %vm51_vm1 = vcmask 130048   ;;  %v384_v21 = vmov 2102212464  }
  0x28   :  { %v281_v4 = vpack.c.bf16 %v43_v3, %v42_v2  ;;  %v264_v6 = vld [vmem:[%s481_s2] ss:$0 sm:$0xff]  ;;  %v385_v23 = vmov 920167782   ;;  %v386_v27 = vmov 1326507024  }
  0x29   :  { %v387_v29 = vmov 683565275   ;;  %v388_v31 = vmov 2475754826   ;;  %v389_v34 = vmov 2131351028  }
  0x2a   :  { %282 = vmatpush3.bf16.msra.mxu0 %v281_v4  ;;  %s390_s1 = smov [#allocation7]  }
  0x2b   :  { %s254_s2 = sshll.u32 %s390_s1, 4  ;;  %s255_s2 = int_to_ptr.vmem [resolvable:$true] %s254_s2 }
  0x2c   :  { %s349_s12 = scalar_lea.vmem %s255_s2, 32  ;;  %p354_p3 = scmp.lt.s32.totalorder %s255_s2, %s255_s2 }
  0x2d   :  { %278 = vmatmul.mubr.msk.f32.vlgmr.msra.gmra.mrb[0].mxu0 %vm51_vm1, %v41_v5  ;;  %p350_p2 = scmp.ne.s32.totalorder %s255_s2, %s349_s12  ;;  %p355_p4 = scmp.lt.s32.totalorder %s349_s12, %s349_s12 }
  0x2f   :  { %p356_p5 = por %p355_p4, %p354_p3 }
  0x31   :  { %p357_p6 = pnand %p356_p5, %p350_p2 }
 0x100   :  { %v121_v7 = vpop.f32.mrb[0].mxu0 }
 0x101   :  { %v445_v8 = vadd.f32 %v264_v6, %v121_v7  ;;  %v279_v9 = vpop.f32.mrb[1].mxu0 }
 0x103   :  { %v143_v10 = vand.u32 2139095040, %v445_v8  ;;  %v140_v11 = vand.u32 2147483647, %v445_v8  ;;  %vm142_vm9 = vcmp.lt.s32.totalorder %v445_v8, 0  ;;  %vm232_vm15 = vweird.f32 %v445_v8 }
 0x105   :  { %v144_v12 = vshrl.u32 %v143_v10, 23  ;;  %v147_v14 = vand.u32 8388607, %v140_v11  ;;  %vm141_vm10 = vcmp.le.f32.partialorder %v140_v11, 0.7853982 }
 0x107   :  { %v266_v13 = vadd.s32 4294967169, %v144_v12  ;;  %v148_v17 = vor.u32 8388608, %v147_v14 }
 0x109   :  { %v150_v15 = vadd.s32 1, %v266_v13  ;;  %v188_v25 = vshll.u32 %v148_v17, 8 }
 0x10b   :  { %vm151_vm2 = vcmp.gt.s32.totalorder %v150_v15, 0 }
 0x10c   :  { %v152_v16 = vsel %vm151_vm2, %v150_v15, 0 }
 0x10d   :  { %v154_v18 = vand.u32 31, %v152_v16  ;;  %v153_v19 = vshrl.u32 %v152_v16, 5 }
 0x10f   :  { %v155_v20 = vsub.s32 32, %v154_v18  ;;  %v166_v22 = vshll.u32 %v384_v21, %v154_v18  ;;  %v169_v24 = vshll.u32 %v385_v23, %v154_v18  ;;  %v157_v30 = vshll.u32 %v387_v29, %v154_v18 }
 0x110   :  { %v160_v33 = vshll.u32 %v388_v31, %v154_v18  ;;  %v163_v36 = vshll.u32 %v389_v34, %v154_v18  ;;  %vm175_vm3 = vcmp.lt.s32.totalorder %v153_v19, 4  ;;  %vm172_vm4 = vcmp.lt.s32.totalorder %v153_v19, 1 }
 0x111   :  { %v167_v26 = vshrl.u32 %v385_v23, %v155_v20  ;;  %v170_v28 = vshrl.u32 %v386_v27, %v155_v20  ;;  %v158_v32 = vshrl.u32 %v388_v31, %v155_v20  ;;  %v161_v35 = vshrl.u32 %v389_v34, %v155_v20 }
 0x112   :  { %v164_v37 = vshrl.u32 %v384_v21, %v155_v20  ;;  %v156_v41 = vshrl.u32 %v387_v29, %v155_v20  ;;  %vm173_vm5 = vcmp.lt.s32.totalorder %v153_v19, 2  ;;  %vm174_vm6 = vcmp.lt.s32.totalorder %v153_v19, 3 }
 0x113   :  { %v168_v38 = vor.u32 %v167_v26, %v166_v22  ;;  %v171_v39 = vor.u32 %v170_v28, %v169_v24  ;;  %v159_v40 = vor.u32 %v158_v32, %v157_v30  ;;  %v162_v42 = vor.u32 %v161_v35, %v160_v33 }
 0x114   :  { %v165_v43 = vor.u32 %v164_v37, %v163_v36  ;;  %v125_v29 = vlaneseq }
 0x115   :  { %v181_v44 = vsel %vm175_vm3, %v168_v38, 920167782  ;;  %v185_v45 = vsel %vm175_vm3, %v171_v39, 1326507024  ;;  %v180_v47 = vsel %vm172_vm4, %v159_v40, %v162_v42  ;;  %v176_v50 = vsel %vm172_vm4, %v156_v41, %v159_v40 }
 0x116   :  { %v177_v46 = vsel %vm175_vm3, %v165_v43, 2102212464  ;;  %v182_v48 = vsel %vm174_vm6, %v165_v43, %v181_v44  ;;  %v184_v49 = vsel %vm172_vm4, %v162_v42, %v165_v43  ;;  %v186_v53 = vsel %vm174_vm6, %v168_v38, %v185_v45 }
 0x117   :  { %v178_v51 = vsel %vm174_vm6, %v162_v42, %v177_v46  ;;  %v183_v52 = vsel %vm173_vm5, %v180_v47, %v182_v48  ;;  %v187_v54 = vsel %vm173_vm5, %v184_v49, %v186_v53  ;;  %v126_v31 = vand.u32 127, %v125_v29 }
 0x118   :  { %v451_v55 = vmul.u32.u64.low %v188_v25, %v183_v52  ;;  %v452_v56 = vmul.u32.u64.high %v188_v25, %v183_v52, %v451_v55  ;;  %v454_v57 = vmul.u32.u64.low %v188_v25, %v187_v54  ;;  %v455_v58 = vmul.u32.u64.high %v188_v25, %v187_v54, %v454_v57 }
 0x119   :  { %v179_v59 = vsel %vm173_vm5, %v176_v50, %v178_v51  ;;  %v131_v34 = vand.u32 31, %v126_v31 }
 0x11a   :  { %v198_v60 = vadd.s32 1, %v452_v56  ;;  %v195_v61 = vmul.u32 %v188_v25, %v179_v59  ;;  %vm197_vm7 = vc.u32 %v455_v58, %v451_v55  ;;  %v196_v10 = vadd.s32 %v451_v55, %v455_v58 }
 0x11b   :  { %vm139_vm13 = vcmp.lt.s32.totalorder %v131_v34, 31 }
 0x11c   :  { %v199_v62 = vsel %vm197_vm7, %v198_v60, %v452_v56 }
 0x11d   :  { %v200_v63 = vadd.s32 %v199_v62, %v195_v61 }
 0x11f   :  { %v201_v0 = vadd.s32 536870912, %v200_v63 }
 0x121   :  { %v202_v1 = vshrl.u32 %v201_v0, 30 }
 0x123   :  { %v203_v2 = vshll.u32 %v202_v1, 30  ;;  %v226_v23 = vsub.s32 4, %v202_v1 }
 0x125   :  { %v204_v3 = vsub.s32 %v200_v63, %v203_v2  ;;  %v227_v26 = vsel %vm142_vm9, %v226_v23, %v202_v1 }
 0x126   :  { %v229_v28 = vsel %vm141_vm10, 0, %v227_v26 }
 0x127   :  { %v206_v4 = vsub.s32 0, %v204_v3  ;;  %v233_v30 = vadd.s32 3, %v229_v28 }
 0x129   :  { %v267_v5 = vmin.u32 %v206_v4, %v204_v3  ;;  %v234_v32 = vand.u32 3, %v233_v30 }
 0x12b   :  { %v208_v6 = vclz %v267_v5  ;;  %vm239_vm11 = vcmp.eq.s32.totalorder %v234_v32, 2  ;;  %vm236_vm12 = vcmp.eq.s32.totalorder %v234_v32, 0  ;;  %vm235_vm14 = vcmp.lt.s32.totalorder %v234_v32, 2 }
 0x12d   :  { %v268_v7 = vadd.s32 4294967294, %v208_v6 }
 0x12f   :  { %vm269_vm8 = vcmp.lt.s32.totalorder %v268_v7, 0 }
 0x130   :  { %v211_v9 = vsel %vm269_vm8, 0, %v268_v7 }
 0x131   :  { %v212_v12 = vsub.s32 32, %v211_v9  ;;  %v216_v13 = vsub.s32 4294967266, %v211_v9  ;;  %v213_v14 = vshll.u32 %v204_v3, %v211_v9 }
 0x133   :  { %v214_v15 = vshrl.u32 %v196_v10, %v212_v12  ;;  %v217_v16 = vadd.s32 127, %v216_v13 }
 0x135   :  { %v215_v17 = vor.u32 %v214_v15, %v213_v14  ;;  %v218_v18 = vshll.u32 %v217_v16, 23 }
 0x137   :  { %v219_v19 = vor.u32 4788187, %v218_v18  ;;  %v222_v21 = vcvt.s32.f32 %v215_v17 }
 0x139   :  { %v220_v20 = vand.u32 2147483647, %v219_v19 }
 0x13b   :  { %v223_v22 = vmul.f32 %v222_v21, %v220_v20 }
 0x13d   :  { %v224_v24 = vxor.u32 2147483648, %v223_v22 }
 0x13f   :  { %v225_v25 = vsel %vm142_vm9, %v224_v24, %v223_v22 }
 0x140   :  { %v228_v27 = vsel %vm141_vm10, %v445_v8, %v225_v25 }
 0x141   :  { %301 = vcosq.f32 %v228_v27 }
 0x142   :  { %303 = vsinq.f32 %v228_v27 }
 0x14b   :  { %v302_v33 = vpop.eup %301 }
 0x14c   :  { %v304_v35 = vpop.eup %303  ;;  %v240_v36 = vxor.u32 2147483648, %v302_v33 }
 0x14d   :  { %v237_v37 = vxor.u32 2147483648, %v304_v35 }
 0x14e   :  { %v241_v38 = vsel %vm239_vm11, %v240_v36, %v304_v35 }
 0x14f   :  { %v238_v11 = vsel %vm236_vm12, %v302_v33, %v237_v37 }
 0x150   :  { %v242_v39 = vsel %vm235_vm14, %v238_v11, %v241_v38 }
 0x151   :  { %v243_v40 = vsel %vm232_vm15, nan, %v242_v39 }
 0x152   :  { %v246_v41 = vsel %vm139_vm13, %v243_v40, %v445_v8 }
 0x153   :  { %247 = vst [vmem:[#allocation7] sm:$0x3] %v246_v41 }
 0x154   :  { %360 = shalt.err (!%p357_p6)
}
 0x155   :  { %s361_s15 = scalar_lea.hbm %s482_s3, 32 }
 0x156   :  { %p362_p7 = scmp.ne.s32.totalorder %s482_s3, %s361_s15  ;;  %p365_p8 = scmp.lt.u32.totalorder %s361_s15, %s482_s3 }
 0x158   :  { %p367_p9 = pnand %p365_p8, %p362_p7 }
 0x15a   :  { %370 = shalt.err (!%p367_p9)
}
 0x15b   :  { %257 = dma.vmem_to_hbm [thread:$0]  %s255_s2, 32, %s482_s3, [#allocation4]  }
 0x15c   :  { %375 = dma.done.wait [#allocation4], 32  }
 0x15d   :  { %376 = vsyncadd [#allocation4], 4294967264 }
 0x15e   :  { %261 = vsyncpa [#allocation3], 1 }
 0x15f   :  { %262 = vsyncpa [#allocation6], 1 }
 0x160   :  { %263 = vsyncpa [#allocation4], 1 }

</bundles_post_ra>
